<compile_context>
chip_gen: v6e
topology: v6e:2x2x1
jax: 0.10.0
libtpu: 0.0.40
codegen_flags: <defaults>
</compile_context>

<pallas_src>
import jax
import jax.numpy as jnp
from jax.experimental import pallas as pl
from jax.experimental.pallas import tpu as pltpu

NUM_REPEATS = 4  # forward appends v1 four times, then cat along dim 1


def mm_cat_kernel(x1_ref, x2_ref, o_ref, acc_ref):
    # K-axis accumulation into an f32 scratch tile.
    @pl.when(pl.program_id(2) == 0)
    def _():
        acc_ref[...] = jnp.zeros_like(acc_ref)

    acc_ref[...] += jnp.dot(
        x1_ref[...], x2_ref[...], preferred_element_type=jnp.float32
    )

    @pl.when(pl.program_id(2) == pl.num_programs(2) - 1)
    def _():
        o_ref[...] = acc_ref[...].astype(o_ref.dtype)


def _round_up(x, m):
    return ((x + m - 1) // m) * m


def mm_cat(x1, x2, *, tm=256, tn=512, tk=512):
    M, K = x1.shape
    K2, N = x2.shape
    assert K == K2, "inner dims must match for torch.mm"
    itemsize = jnp.dtype(x1.dtype).itemsize

    # --- pad to (8, 128)-aligned, tile-divisible shapes --------------------
    Mp = _round_up(M, 8)
    Kp = _round_up(K, 128)
    Np = _round_up(N, 128)
    tm = min(tm, Mp)
    tk = min(tk, Kp)
    tn = min(tn, Np)
    Mp = _round_up(Mp, tm)
    Kp = _round_up(Kp, tk)
    Np = _round_up(Np, tn)

    x1p = x1 if (Mp == M and Kp == K) else jnp.pad(x1, ((0, Mp - M), (0, Kp - K)))
    x2p = x2 if (Kp == K and Np == N) else jnp.pad(x2, ((0, Kp - K), (0, Np - N)))

    n_bn = Np // tn  # number of column blocks of the (un-replicated) product
    grid = (Mp // tm, NUM_REPEATS * n_bn, Kp // tk)

    cost = pl.CostEstimate(
        flops=2 * Mp * Kp * Np * NUM_REPEATS,
        transcendentals=0,
        bytes_accessed=(Mp * Kp + Kp * Np + NUM_REPEATS * Mp * Np) * itemsize,
    )

    out_p = pl.pallas_call(
        mm_cat_kernel,
        out_shape=jax.ShapeDtypeStruct((Mp, NUM_REPEATS * Np), x1.dtype),
        grid_spec=pltpu.PrefetchScalarGridSpec(
            num_scalar_prefetch=0,
            grid=grid,
            in_specs=[
                # x1 tile depends on (row block, k block)
                pl.BlockSpec((tm, tk), lambda i, jj, k: (i, k)),
                # x2 tile: the replicated output column block jj maps back to
                # the underlying product column block jj % n_bn
                pl.BlockSpec((tk, tn), lambda i, jj, k: (k, jj % n_bn)),
            ],
            # output tile is written directly at replicated column block jj
            out_specs=pl.BlockSpec((tm, tn), lambda i, jj, k: (i, jj)),
            scratch_shapes=[pltpu.VMEM((tm, tn), jnp.float32)],
        ),
        compiler_params=pltpu.CompilerParams(
            dimension_semantics=("parallel", "parallel", "arbitrary"),
        ),
        cost_estimate=cost,
    )(x1p, x2p)

    if Mp == M and Np == N:
        return out_p  # aligned case: kernel output is already cat([v1]*4, dim=1)

    # Ragged case: each copy r lives at padded columns [r*Np, r*Np + N).
    return jnp.concatenate(
        [out_p[:M, r * Np : r * Np + N] for r in range(NUM_REPEATS)], axis=1
    )


def reference(x1, x2):
    v1 = x1 @ x2
    return jnp.concatenate([v1] * NUM_REPEATS, axis=1)


if __name__ == "__main__":
    key = jax.random.PRNGKey(0)
    k1, k2 = jax.random.split(key)
    # matches torch.randn(2, 2) inputs of the original module
    x1 = jax.random.normal(k1, (2, 2), dtype=jnp.float32)
    x2 = jax.random.normal(k2, (2, 2), dtype=jnp.float32)

    out = mm_cat(x1, x2)
    out = jax.block_until_ready(out)

    ref = reference(x1, x2)
    assert out.shape == (2, 8), out.shape
    assert jnp.allclose(out, ref, atol=1e-5, rtol=1e-5), "mismatch vs reference"

    # also sanity-check a tile-aligned shape so the fast (no-fixup) path is exercised
    xa = jax.random.normal(k1, (256, 512), dtype=jnp.float32)
    xb = jax.random.normal(k2, (512, 512), dtype=jnp.float32)
    outa = jax.block_until_ready(mm_cat(xa, xb))
    refa = reference(xa, xb)
    assert outa.shape == (256, 4 * 512), outa.shape
    assert jnp.allclose(outa, refa, atol=1e-3, rtol=1e-3), "mismatch (aligned case)"

    print("KERNEL_OK")
</pallas_src>

<mosaic_0001>
module attributes {stable_mosaic.version = 11 : i64} {
  func.func @mm_cat_kernel(%arg0: i32, %arg1: i32, %arg2: i32, %arg3: memref<8x128xf32, #tpu.memory_space<vmem>>, %arg4: memref<128x128xf32, #tpu.memory_space<vmem>>, %arg5: memref<8x128xf32, #tpu.memory_space<vmem>>, %arg6: memref<8x128xf32, #tpu.memory_space<vmem>>) attributes {dimension_semantics = [#tpu.dimension_semantics<parallel>, #tpu.dimension_semantics<parallel>, #tpu.dimension_semantics<arbitrary>], iteration_bounds = array<i64: 1, 4, 1>, scalar_prefetch = 0 : i64, scratch_operands = 1 : i64, tpu.core_type = #tpu.core_type<tc>, window_params = [{transform_indices = @transform_0, window_bounds = array<i64: 8, 128>}, {transform_indices = @transform_1, window_bounds = array<i64: 128, 128>}, {transform_indices = @transform_2, window_bounds = array<i64: 8, 128>}]} {
    %c0_i32 = arith.constant 0 : i32
    %0 = arith.cmpi eq, %arg2, %c0_i32 : i32
    %1 = arith.extui %0 : i1 to i32
    %c0_i32_0 = arith.constant 0 : i32
    %2 = arith.cmpi ne, %1, %c0_i32_0 : i32
    scf.if %2 {
      %cst_10 = arith.constant 0.000000e+00 : f32
      %12 = vector.broadcast %cst_10 : f32 to vector<8x128xf32>
      %c0_11 = arith.constant 0 : index
      %c0_12 = arith.constant 0 : index
      %13 = vector.load %arg6[%c0_11, %c0_12] : memref<8x128xf32, #tpu.memory_space<vmem>>, vector<8x128xf32>
      tpu.vector_store %arg6[%c0_11, %c0_12], %12 {strides = array<i32>} : memref<8x128xf32, #tpu.memory_space<vmem>>, vector<8x128xf32>,
    } else {
    }
    %c0 = arith.constant 0 : index
    %c0_1 = arith.constant 0 : index
    %3 = vector.load %arg6[%c0, %c0_1] : memref<8x128xf32, #tpu.memory_space<vmem>>, vector<8x128xf32>
    %c0_2 = arith.constant 0 : index
    %c0_3 = arith.constant 0 : index
    %4 = vector.load %arg3[%c0_2, %c0_3] : memref<8x128xf32, #tpu.memory_space<vmem>>, vector<8x128xf32>
    %c0_4 = arith.constant 0 : index
    %c0_5 = arith.constant 0 : index
    %5 = vector.load %arg4[%c0_4, %c0_5] : memref<128x128xf32, #tpu.memory_space<vmem>>, vector<128x128xf32>
    %cst = arith.constant dense<0.000000e+00> : vector<8x128xf32>
    %6 = tpu.matmul %4, %5, %cst {dimension_numbers = #tpu.dot_dimension_numbers<[1], [0], [0], [1], [0, 0, 1, 1], [], []>} : vector<8x128xf32>, vector<128x128xf32>, vector<8x128xf32> -> vector<8x128xf32>
    %7 = arith.addf %3, %6 : vector<8x128xf32>
    %c0_6 = arith.constant 0 : index
    %c0_7 = arith.constant 0 : index
    %8 = vector.load %arg6[%c0_6, %c0_7] : memref<8x128xf32, #tpu.memory_space<vmem>>, vector<8x128xf32>
    tpu.vector_store %arg6[%c0_6, %c0_7], %7 {strides = array<i32>} : memref<8x128xf32, #tpu.memory_space<vmem>>, vector<8x128xf32>,
    %c0_i32_8 = arith.constant 0 : i32
    %9 = arith.cmpi eq, %arg2, %c0_i32_8 : i32
    %10 = arith.extui %9 : i1 to i32
    %c0_i32_9 = arith.constant 0 : i32
    %11 = arith.cmpi ne, %10, %c0_i32_9 : i32
    scf.if %11 {
      %c0_10 = arith.constant 0 : index
      %c0_11 = arith.constant 0 : index
      %12 = vector.load %arg6[%c0_10, %c0_11] : memref<8x128xf32, #tpu.memory_space<vmem>>, vector<8x128xf32>
      %c0_12 = arith.constant 0 : index
      %c0_13 = arith.constant 0 : index
      %13 = vector.load %arg5[%c0_12, %c0_13] : memref<8x128xf32, #tpu.memory_space<vmem>>, vector<8x128xf32>
      tpu.vector_store %arg5[%c0_12, %c0_13], %12 {strides = array<i32>} : memref<8x128xf32, #tpu.memory_space<vmem>>, vector<8x128xf32>,
    } else {
    }
    return
  }
  func.func @transform_0(%arg0: i32, %arg1: i32, %arg2: i32) -> (i32, i32) {
    %c0_i32 = arith.constant 0 : i32
    return %arg0, %arg2 : i32, i32
  }
  func.func @transform_1(%arg0: i32, %arg1: i32, %arg2: i32) -> (i32, i32) {
    %c1_i32 = arith.constant 1 : i32
    %c0_i32 = arith.constant 0 : i32
    %0 = arith.cmpi eq, %c1_i32, %c0_i32 : i32
    %c1_i32_0 = arith.constant 1 : i32
    %1 = arith.select %0, %c1_i32_0, %c1_i32 : i32
    %2 = arith.remsi %arg1, %1 : i32
    %c0_i32_1 = arith.constant 0 : i32
    %3 = arith.cmpi ne, %2, %c0_i32_1 : i32
    %c0_i32_2 = arith.constant 0 : i32
    %4 = arith.cmpi slt, %2, %c0_i32_2 : i32
    %c0_i32_3 = arith.constant 0 : i32
    %5 = arith.cmpi slt, %1, %c0_i32_3 : i32
    %6 = arith.xori %4, %5 : i1
    %7 = arith.andi %6, %3 : i1
    %8 = arith.addi %2, %1 : i32
    %9 = arith.select %7, %8, %2 : i32
    %c0_i32_4 = arith.constant 0 : i32
    return %arg2, %9 : i32, i32
  }
  func.func @transform_2(%arg0: i32, %arg1: i32, %arg2: i32) -> (i32, i32) {
    %c0_i32 = arith.constant 0 : i32
    return %arg0, %arg1 : i32, i32
  }
}

</mosaic_0001>

<bundles_post_ra>
// kernel: tpu_custom_call.1
= control target key start
LH: loop header
LB: loop body
LE: loop exit
PB: predicated region body
PF: predicated region fallthrough
CT: control target
= control target key end

     0   :  { %7 = vsyncpa [#allocation4], 0  ;;  %s848_s0 = inlined_call_operand.hbm [shape: f32[8,128], index: 0, kind: input, shape index: {}]   ;;  %s849_s1 = inlined_call_operand.hbm [shape: f32[128,128], index: 1, kind: input, shape index: {}]   ;;  %s850_s2 = inlined_call_operand.hbm [shape: f32[8,512], index: 2, kind: output, shape index: {}]  }
   0x1   :  { %8 = vsyncpa [#allocation7], 0 }
   0x2   :  { %9 = vsyncpa [#allocation5], 0 }
   0x3   :  { %11 = vsyncpa [#allocation5 + $0x1], 0  ;;  %s698_s9 = smov 0   ;;  %s700_s10 = smov 0  }
   0x4   :  { %s702_s11 = smov 0   ;;  %s704_s12 = smov 0  }
   0x5   :  { %s706_s13 = smov 0   ;;  %s708_s14 = smov 0  }
   0x6 LB: > { %s393_s15 = sadd.s32 4294967295, %s674_s14   ;;  %s394_s16 = sadd.s32 4294967294, %s674_s14   ;;  %s674_s14 = sphi %s708_s14, %s17_s14   ;;  %s670_s13 = sphi %s706_s13, %s868_s13   ;;  %s666_s12 = sphi %s704_s12, %s867_s12   ;;  %s662_s11 = sphi %s702_s11, %s866_s11   ;;  %s658_s10 = sphi %s700_s10, %s865_s10   ;;  %s654_s9 = sphi %s698_s9, %s864_s9  }
   0x7   : > { %s32_s17 = sadd.s32 1, %s670_s13  ;;  %s99_s18 = sadd.s32 1, %s662_s11 }
   0x8   : > { %p34_p0 = scmp.ge.s32.totalorder %s32_s17, 4  ;;  %p109_p1 = scmp.ne.s32.totalorder %s662_s11, %s658_s10 }
   0x9   : > { %p110_p2 = scmp.eq.s32.totalorder %s393_s15, 3  ;;  %p115_p3 = scmp.ne.s32.totalorder %s658_s10, %s654_s9 }
   0xa   : > { %s870_s17 = smov (%p34_p0, %s32_s17), 0  ;;  %p116_p5 = scmp.eq.s32.totalorder %s394_s16, 3 }
   0xb   : > { %p738_p4 = por %p110_p2, %p109_p1  ;;  %s95_s20 = ssub.s32 %s670_s13, %s870_s17 }
   0xc   : > { %p395_p6 = scmp.ge.s32.totalorder %s674_s14, 1  ;;  %p97_p7 = scmp.eq.s32.totalorder %s95_s20, 0 }
   0xd   : > { %s855_s19 = scalar_select %p738_p4, 1, 0 }
   0xe   : > { %p745_p8 = por %p116_p5, %p115_p3  ;;  %p123_p9 = scmp.lt.s32.totalorder %s674_s14, 5 }
   0xf   : > { %s751_s22 = scalar_select %p97_p7, %s662_s11, %s99_s18  }
  0x10   : > { %s856_s21 = scalar_select %p745_p8, 1, 0 }
  0x11   : > { %p753_p10 = pnand %p395_p6, %p123_p9  ;;  %p757_p11 = scmp.eq.s32.totalorder %s393_s15, 0 }
  0x12   : > { %s676_s25 = smov [#allocation3]   ;;  %s677_s27 = smov [#allocation6]  }
  0x13   : > { %s857_s23 = scalar_select %p753_p10, 1, 0 }
  0x14   : > { %s858_s24 = scalar_select %p757_p11, 1, 0 }
  0x15   : > { %p468_p12 = pneg %p753_p10  ;;  %s139_s26 = sshll.u32 %s676_s25, 4  ;;  %s140_s26 = int_to_ptr.vmem [resolvable:$true] %s139_s26 }
  0x16   : > { %s152_s28 = sshll.u32 %s677_s27, 4  ;;  %s549_s30 = scalar_lea.vmem %s140_s26, 128  ;;  %s153_s28 = int_to_ptr.vmem [resolvable:$true] %s152_s28 }
  0x17   : > { %p765_p13 = pnand %p757_p11, %p468_p12  ;;  %p550_p1 = scmp.ne.s32.totalorder %s140_s26, %s549_s30 }
  0x18   : > { %p557_p5 = scmp.lt.s32.totalorder %s140_s26, %s140_s26  ;;  %p558_p6 = scmp.lt.s32.totalorder %s549_s30, %s549_s30 }
  0x19   : > { %p540_p0 = pneg %p765_p13 }
  0x1a   : > { %p559_p7 = por %p558_p6, %p557_p5 }
  0x1b   : > { %p552_p2 = pnand %p550_p1, %p540_p0 }
  0x1d   : > { %p553_p3 = pneg %p552_p2 }
  0x1f   : > { %p560_p9 = pnand %p559_p7, %p553_p3 }
  0x21   : > { %563 = shalt.err (!%p560_p9)
}
  0x22   : > { %471 = dma.hbm_to_vmem [thread:$0]  (!%p765_p13), %s848_s0, 128, %s140_s26, [#allocation4]  }
  0x23   : > { %s575_s5 = scalar_lea.vmem %s153_s28, 2048  ;;  %p583_p1 = scmp.lt.s32.totalorder %s153_s28, %s153_s28 }
  0x24   : > { %p576_p12 = scmp.ne.s32.totalorder %s153_s28, %s575_s5  ;;  %p584_p2 = scmp.lt.s32.totalorder %s575_s5, %s575_s5 }
  0x26   : > { %p578_p8 = pnand %p576_p12, %p540_p0  ;;  %p585_p11 = por %p584_p2, %p583_p1 }
  0x28   : > { %p579_p4 = pneg %p578_p8 }
  0x2a   : > { %p586_p10 = pnand %p585_p11, %p579_p4 }
  0x2c   : > { %589 = shalt.err (!%p586_p10)
}
  0x2d   : > { %s678_s6 = smov 128   ;;  %s679_s7 = smov 8  }
  0x2e   : > { %474 = dma.hbm_to_vmem [thread:$0]  (!%p765_p13), %s849_s1, 2048, %s153_s28, [#allocation7], %s678_s6, %s678_s6, %s679_s7  }
  0x2f   : > { %p860_p3 = scmp.ne.s32.totalorder %s857_s23, 0 }
  0x30   : > { %p861_p5 = scmp.ne.s32.totalorder (!%p860_p3), %s858_s24, 0 }
  0x31   : > { %168 = sbr.rel (%p860_p3) target bundleno = 297 (0x129), region = 28 }
  0x36   : > { %641 = dma.done.wait (%p861_p5), [#allocation4], 128  }
  0x37   : > { %643 = vsyncadd (%p861_p5), [#allocation4], 4294967168 }
  0x38   : > { %645 = dma.done.wait (%p861_p5), [#allocation7], 2048  }
  0x39   : > { %647 = vsyncadd (%p861_p5), [#allocation7], 4294965248  ;;  %v680_v0 = vmov 0.0   ;;  %vm681_vm0 = vmmov 0   ;;  %v212_v1 = vld [vmem:[#allocation6 + $0x78] sm:$0xff]  ;;  %v211_v2 = vld [vmem:[#allocation6 + $0x70] sm:$0xff] }
  0x3a   : > { %423 = vmatprep.subr.mxu0 %v680_v0  ;;  %455 = vmatprep.mubr.msk.f32.mxu0 %vm681_vm0, %v680_v0  ;;  %v210_v3 = vld [vmem:[#allocation6 + $0x68] sm:$0xff]  ;;  %v209_v4 = vld [vmem:[#allocation6 + $0x60] sm:$0xff]  ;;  %v208_v5 = vld [vmem:[#allocation6 + $0x58] sm:$0xff]  ;;  %s186_s16 = sand.u32 1, %s658_s10   ;;  %s403_s24 = sshll.u32 %s666_s12, 7 }
  0x3b   : > { %424 = vmatpush3.msra.mxu0 %v212_v1  ;;  %v207_v6 = vld [vmem:[#allocation6 + $0x50] sm:$0xff]  ;;  %v206_v7 = vld [vmem:[#allocation6 + $0x48] sm:$0xff]  ;;  %v205_v8 = vld [vmem:[#allocation6 + $0x40] sm:$0xff]  ;;  %s401_s18 = sshll.u32 %s186_s16, 3  ;;  %s804_s27 = scalar_lea.hbm %s850_s2, %s403_s24 }
  0x3c   : > { %425 = vmatprep.subr.mxu0 %v680_v0  ;;  %v204_v9 = vld [vmem:[#allocation6 + $0x38] sm:$0xff]  ;;  %v203_v10 = vld [vmem:[#allocation6 + $0x30] sm:$0xff]  ;;  %v202_v11 = vld [vmem:[#allocation6 + $0x28] sm:$0xff]  ;;  %s188_s20 = scalar_lea.vmem [#allocation8], %s401_s18  ;;  %s291_s28 = scalar_lea.sflag [#allocation5], %s186_s16 }
  0x3d   : > { %426 = vmatpush3.msra.mxu0 %v211_v2  ;;  %v201_v12 = vld [vmem:[#allocation6 + $0x20] sm:$0xff]  ;;  %v200_v13 = vld [vmem:[#allocation6 + $0x18] sm:$0xff]  ;;  %v199_v14 = vld [vmem:[#allocation6 + $0x10] sm:$0xff]  ;;  %s306_s23 = sshll.u32 %s188_s20, 4  ;;  %p862_p8 = scmp.ne.s32.totalorder %s855_s19, 0  ;;  %s799_s23 = int_to_ptr.vmem [resolvable:$true] %s306_s23 }
  0x3e   : > { %427 = vmatprep.subr.mxu0 %v680_v0  ;;  %v198_v15 = vld [vmem:[#allocation6 + $0x8] sm:$0xff]  ;;  %v197_v16 = vld [vmem:[#allocation6] sm:$0xff]  ;;  %v196_v17 = vld [vmem:[#allocation3] sm:$0xff]  ;;  %s590_s29 = scalar_lea.vmem %s799_s23, 128  ;;  %s682_s12 = smov [#allocation8]  }
  0x3f   : > { %428 = vmatpush3.msra.mxu0 %v210_v3  ;;  %p591_p4 = scmp.ne.s32.totalorder %s799_s23, %s590_s29  ;;  %s594_s30 = sshll.u32 %s682_s12, 4  ;;  %s595_s30 = int_to_ptr.vmem [resolvable:$false] %s594_s30 }
  0x40   : > { %429 = vmatprep.subr.mxu0 %v680_v0  ;;  %s596_s3 = scalar_lea.vmem %s595_s30, 256  ;;  %p597_p13 = scmp.lt.s32.totalorder %s799_s23, %s595_s30 }
  0x41   : > { %430 = vmatpush3.msra.mxu0 %v209_v4  ;;  %p592_p10 = pnand %p591_p4, %p862_p8  ;;  %p598_p0 = scmp.lt.s32.totalorder %s596_s3, %s590_s29 }
  0x42   : > { %431 = vmatprep.subr.mxu0 %v680_v0 }
  0x43   : > { %432 = vmatpush3.msra.mxu0 %v208_v5  ;;  %p593_p11 = pneg %p592_p10  ;;  %p599_p6 = por %p598_p0, %p597_p13 }
  0x44   : > { %433 = vmatprep.subr.mxu0 %v680_v0 }
  0x45   : > { %434 = vmatpush3.msra.mxu0 %v207_v6  ;;  %p600_p7 = pnand %p599_p6, %p593_p11 }
  0x46   : > { %435 = vmatprep.subr.mxu0 %v680_v0 }
  0x47   : > { %436 = vmatpush3.msra.mxu0 %v206_v7 }
  0x48   : > { %437 = vmatprep.subr.mxu0 %v680_v0 }
  0x49   : > { %438 = vmatpush3.msra.mxu0 %v205_v8 }
  0x4a   : > { %439 = vmatprep.subr.mxu0 %v680_v0 }
  0x4b   : > { %440 = vmatpush3.msra.mxu0 %v204_v9 }
  0x4c   : > { %441 = vmatprep.subr.mxu0 %v680_v0 }
  0x4d   : > { %442 = vmatpush3.msra.mxu0 %v203_v10 }
  0x4e   : > { %443 = vmatprep.subr.mxu0 %v680_v0 }
  0x4f   : > { %444 = vmatpush3.msra.mxu0 %v202_v11 }
  0x50   : > { %445 = vmatprep.subr.mxu0 %v680_v0 }
  0x51   : > { %446 = vmatpush3.msra.mxu0 %v201_v12 }
  0x52   : > { %447 = vmatprep.subr.mxu0 %v680_v0 }
  0x53   : > { %448 = vmatpush3.msra.mxu0 %v200_v13 }
  0x54   : > { %449 = vmatprep.subr.mxu0 %v680_v0 }
  0x55   : > { %450 = vmatpush3.msra.mxu0 %v199_v14 }
  0x56   : > { %451 = vmatprep.subr.mxu0 %v680_v0 }
  0x57   : > { %452 = vmatpush3.msra.mxu0 %v198_v15 }
  0x58   : > { %453 = vmatprep.subr.mxu0 %v680_v0 }
  0x59   : > { %454 = vmatpush3.msra.mxu0 %v197_v16 }
  0x5a   : > { %456 = vmatmul.mubr.f32.vlgmr.msra.gmra.mxu0 %v196_v17 }
 0x11a   : > { %v279_v18 = vpop.f32.mrf.mxu0 }
 0x11b   : > { %289 = vst [vmem:[%s188_s20] sm:$0xff] %v279_v18 }
 0x11c   : > { %v457_v19 = vpop.f32.mrf.mxu0 }
 0x11d   : > { %603 = shalt.err (!%p600_p7)
}
 0x11e   : > { %s604_s4 = scalar_lea.hbm %s804_s27, 128  ;;  %s608_s7 = scalar_lea.hbm %s850_s2, 512 }
 0x11f   : > { %p605_p9 = scmp.ne.s32.totalorder %s804_s27, %s604_s4  ;;  %p609_p2 = scmp.lt.s32.totalorder %s804_s27, %s850_s2 }
 0x120   : > { %p610_p3 = scmp.lt.s32.totalorder %s608_s7, %s604_s4 }
 0x121   : > { %p606_p12 = pnand %p605_p9, %p862_p8 }
 0x122   : > { %p611_p5 = por %p610_p3, %p609_p2 }
 0x123   : > { %p607_p1 = pneg %p606_p12 }
 0x125   : > { %p612_p4 = pnand %p611_p5, %p607_p1 }
 0x127   : > { %615 = shalt.err (!%p612_p4)
}
 0x128   : > { %466 = dma.vmem_to_hbm [thread:$0]  (%p862_p8), %s799_s23, 128, %s804_s27, %s291_s28  }
 0x129 PF: > { %p483_p10 = scmp.ge.s32.totalorder %s674_s14, 2  ;;  %s318_s16 = sand.u32 1, %s654_s9  }
 0x12a   : > { %p863_p11 = scmp.ne.s32.totalorder %s856_s21, 0  ;;  %s319_s18 = scalar_lea.sflag [#allocation5], %s318_s16 }
 0x12c   : > { %p476_p13 = pnand %p483_p10, %p863_p11 }
 0x12e   : > { %p477_p0 = pneg %p476_p13 }
 0x130   : > { %649 = dma.done.wait (%p477_p0), %s319_s18, 128  }
 0x131   : > { %651 = vsyncadd (%p477_p0), %s319_s18, 4294967168  ;;  %s17_s14 = sadd.s32 1, %s674_s14   ;;  %s864_s9 = smov %s658_s10 }
 0x132   : > { %p14_p6 = scmp.ge.s32.totalorder %s17_s14, 6   ;;  %s865_s10 = smov %s662_s11 }
 0x133   : > { %s866_s11 = smov %s751_s22  ;;  %s867_s12 = smov %s670_s13 }
 0x134   : > { %s868_s13 = smov %s870_s17  ;;  %16 = sbr.rel (!%p14_p6) target bundleno = 6 (0x6), region = 79 }
 0x139   :  { %324 = vsyncpa [#allocation4], 1 }
 0x13a   :  { %326 = vsyncpa [#allocation4 + $0x1], 1 }
 0x13b   :  { %327 = vsyncpa [#allocation7], 1 }
 0x13c   :  { %328 = vsyncpa [#allocation5], 1 }
 0x13d   :  { %330 = vsyncpa [#allocation5 + $0x1], 1 }

</bundles_post_ra>
